<compile_context>
chip_gen: v5e
topology: v5e:2x2
jax: 0.10.0
libtpu: 0.0.40
codegen_flags: <defaults>
</compile_context>

<pallas_src>
import functools

import jax
import jax.numpy as jnp
from jax.experimental import pallas as pl
from jax.experimental.pallas import tpu as pltpu


_MEGACORE_MIN_BYTES = 1 * 1024 * 1024  # below this, don't bother splitting for 2 TCs


def _cdiv(a, b):
    return (a + b - 1) // b


def _round_up(a, m):
    return _cdiv(a, m) * m


@functools.lru_cache(maxsize=1)
def _target_block_bytes() -> int:
    """Per-block VMEM budget, scaled by TPU generation.

    v6e/v7x: ~4 MiB blocks (5 resident blocks ~= 20 MiB with the single-buffered pos
    block, under the 32 MiB default scoped VMEM).  v5e / older / unknown: 2 MiB keeps
    the working set under the 16 MiB default without any vmem_limit override.
    """
    try:
        kind = jax.devices()[0].device_kind.lower()
    except Exception:
        kind = ""
    if "v6" in kind or "v7" in kind or "7x" in kind:
        return 4 * 1024 * 1024
    return 2 * 1024 * 1024


def _sublane_multiple(*dtypes) -> int:
    """Minimum second-to-last block-dim multiple: 8 f32, 16 bf16/f16, 32 int8/fp8."""
    m = 8
    for dt in dtypes:
        m = max(m, 32 // max(1, jnp.dtype(dt).itemsize))
    return m


def _pos_block_spec(block_shape, index_map):
    # The pos block index only changes on the outer grid axis, so its DMA is already
    # skipped across inner (batch) steps; a single buffer is enough -> reclaim VMEM.
    try:
        return pl.BlockSpec(block_shape, index_map, pipeline_mode=pl.Buffered(1))
    except (TypeError, AttributeError):  # older API without pipeline_mode/Buffered
        return pl.BlockSpec(block_shape, index_map)


def _make_kernel(epilogue):
    def kernel(x_ref, pos_ref, o_ref):
        y = x_ref[...] + pos_ref[...]  # broadcast over the leading (batch) dim
        if epilogue is not None:
            y = epilogue(y)  # fused elementwise epilogue: free, kernel is HBM-bound
        o_ref[...] = y.astype(o_ref.dtype)

    return kernel


def _forward_3d(x, pos_embed, out_dtype, epilogue, donate_x, cost):
    """Path for D % 128 == 0: keep (B, S, D), window the full pos table."""
    B, S, D = x.shape
    max_len = pos_embed.shape[1]
    itemsize = jnp.dtype(out_dtype).itemsize
    target = _target_block_bytes()
    mult = _sublane_multiple(x.dtype, pos_embed.dtype, out_dtype)

    row_bytes = D * itemsize
    seq_bytes = S * row_bytes
    total_bytes = B * seq_bytes
    want_two = total_bytes >= _MEGACORE_MIN_BYTES  # give both v7x cores work

    if seq_bytes <= target and (B >= 2 or not want_two or S < 2 * mult):
        # Whole sequence per block; tile (near-evenly) over the batch axis only.
        TS = S
        n_b = max(1, _cdiv(total_bytes, target))
        if want_two and B >= 2:
            n_b = max(n_b, 2)
        n_b = min(n_b, B)
        TB = _cdiv(B, n_b)  # leading dim: no sublane constraint; tiles differ by <= 1
    else:
        # Tile the sequence dimension into near-equal, sublane-aligned chunks.
        TB = 1
        n_s = max(_cdiv(seq_bytes, target), 2 if want_two else 1)
        TS = min(S, _round_up(_cdiv(S, n_s), mult))

    grid = (_cdiv(S, TS), _cdiv(B, TB))  # batch innermost -> pos block stays resident

    # Window the *full* pos table whenever the tiling constraint allows it.
    if TS % mult == 0 or TS == max_len:
        pos_arg = pos_embed
    else:
        pos_arg = pos_embed[:, :S, :]  # rare corner: tiny XLA pre-slice

    aliases = {0: 0} if (donate_x and x.dtype == out_dtype) else {}

    return pl.pallas_call(
        _make_kernel(epilogue),
        out_shape=jax.ShapeDtypeStruct((B, S, D), out_dtype),
        grid_spec=pltpu.PrefetchScalarGridSpec(
            num_scalar_prefetch=0,
            grid=grid,
            in_specs=[
                pl.BlockSpec((TB, TS, D), lambda s, b: (b, s, 0)),
                _pos_block_spec((1, TS, D), lambda s, b: (0, s, 0)),
            ],
            out_specs=pl.BlockSpec((TB, TS, D), lambda s, b: (b, s, 0)),
        ),
        compiler_params=pltpu.CompilerParams(
            dimension_semantics=("parallel", "parallel")
        ),
        cost_estimate=cost,
        input_output_aliases=aliases,
    )(x, pos_arg)


def _forward_flat(x, pos_embed, out_dtype, epilogue, cost):
    """Path for D not a multiple of 128: flatten to a lane-dense (B, S*D) view."""
    B, S, D = x.shape
    max_len = pos_embed.shape[1]
    itemsize = jnp.dtype(out_dtype).itemsize
    target = _target_block_bytes()
    mult = _sublane_multiple(x.dtype, pos_embed.dtype, out_dtype)

    L = S * D
    x2 = x.reshape(B, L)  # contiguous reshape -> free
    total_bytes = B * L * itemsize
    want_two = total_bytes >= _MEGACORE_MIN_BYTES

    # Batch tile: keep all rows when even a single 128-lane column of every row fits
    # the budget, otherwise the largest sublane-aligned row count that does.
    if B * 128 * itemsize <= target or B <= mult:
        TB = B
    else:
        TB = min(B, max(mult, (target // (128 * itemsize)) // mult * mult))
    n_b = _cdiv(B, TB)

    # Lane tiles: near-equal 128-multiples sized to the VMEM budget.
    n_l = max(1, _cdiv(TB * L * itemsize, target))

    # Guarantee >= 2 balanced grid steps for megacore when the size warrants it.
    if want_two and n_b * n_l < 2:
        if L >= 256:
            n_l = 2
        elif B > mult:
            TB = min(B, _round_up(_cdiv(B, 2), mult))
            n_b = _cdiv(B, TB)

    TL = min(L, _round_up(_cdiv(L, n_l), 128))
    n_l = _cdiv(L, TL)

    # Window the full flattened pos table when the block shape allows it; otherwise
    # fall back to a tiny pre-slice (the block then spans the full extent).
    if TL % 128 == 0 or TL == max_len * D:
        pos2 = pos_embed.reshape(1, max_len * D)  # free reshape, windowed by BlockSpec
    else:
        pos2 = pos_embed[:, :S, :].reshape(1, L)

    grid = (n_l, n_b)  # batch innermost -> pos block stays resident

    out2 = pl.pallas_call(
        _make_kernel(epilogue),
        out_shape=jax.ShapeDtypeStruct((B, L), out_dtype),
        grid_spec=pltpu.PrefetchScalarGridSpec(
            num_scalar_prefetch=0,
            grid=grid,
            in_specs=[
                pl.BlockSpec((TB, TL), lambda l, b: (b, l)),
                _pos_block_spec((1, TL), lambda l, b: (0, l)),
            ],
            out_specs=pl.BlockSpec((TB, TL), lambda l, b: (b, l)),
        ),
        compiler_params=pltpu.CompilerParams(
            dimension_semantics=("parallel", "parallel")
        ),
        cost_estimate=cost,
    )(x2, pos2)
    return out2.reshape(B, S, D)


def positional_encoding_forward(x: jax.Array, pos_embed: jax.Array, *,
                                epilogue=None, donate_x: bool = False) -> jax.Array:
    """x: (B, S, D); pos_embed: (1, max_len, D). Returns x + pos_embed[:, :S, :].

    epilogue: optional elementwise fn fused into the same HBM pass (default None
              keeps the original module semantics).
    donate_x: alias the output onto x's buffer when the caller no longer needs x.
    """
    B, S, D = x.shape
    assert pos_embed.ndim == 3 and pos_embed.shape[0] == 1 and pos_embed.shape[2] == D
    max_len = pos_embed.shape[1]
    assert S <= max_len, "sequence length exceeds max_len"

    out_dtype = jnp.result_type(x.dtype, pos_embed.dtype)
    itemsize = jnp.dtype(out_dtype).itemsize

    # Advisory cost for XLA's scheduler: 1 add/element, read x + pos window, write out.
    cost = pl.CostEstimate(
        flops=B * S * D,
        transcendentals=0,
        bytes_accessed=(2 * B * S * D + S * D) * itemsize,
    )

    if D % 128 == 0:
        return _forward_3d(x, pos_embed, out_dtype, epilogue, donate_x, cost)
    return _forward_flat(x, pos_embed, out_dtype, epilogue, cost)


if __name__ == "__main__":
    key = jax.random.PRNGKey(0)

    def run_case(B, S, D, max_len, case_key, dtype=jnp.float32):
        kx, kp = jax.random.split(case_key)
        x = jax.random.normal(kx, (B, S, D), dtype=jnp.float32).astype(dtype)
        # Deterministic parameter init matching nn.init.normal_(mean=0, std=0.02)
        pos_embed = (0.02 * jax.random.normal(kp, (1, max_len, D),
                                              dtype=jnp.float32)).astype(dtype)

        out = jax.block_until_ready(positional_encoding_forward(x, pos_embed))
        ref = x + pos_embed[:, :S, :]
        assert out.shape == (B, S, D), (out.shape, (B, S, D))
        tol = 1e-6 if dtype == jnp.float32 else 1e-2
        assert jnp.allclose(out.astype(jnp.float32), ref.astype(jnp.float32),
                            atol=tol, rtol=tol), (B, S, D, max_len, str(dtype))

    k1, k2, k3, k4 = jax.random.split(key, 4)
    # Small demo shape (D=32 < 128): lane-dense flattened path.
    run_case(2, 8, 32, 16, k1)
    # D multiple of 128: 3-D path windowing the full pos table (no pre-slice).
    run_case(2, 16, 128, 32, k2)
    # Exercises balanced sequence/batch tiling, megacore split and pos-block residency.
    run_case(2, 2304, 256, 2560, k3)
    # bf16: exercises the dtype-aware (16, 128) sublane multiple.
    run_case(4, 512, 384, 1024, k4, dtype=jnp.bfloat16)

    print("KERNEL_OK")
</pallas_src>

<mosaic_0001>
module attributes {stable_mosaic.version = 11 : i64} {
  func.func @kernel(%arg0: i32, %arg1: i32, %arg2: memref<2x256xf32, #tpu.memory_space<vmem>>, %arg3: memref<1x256xf32, #tpu.memory_space<vmem>>, %arg4: memref<2x256xf32, #tpu.memory_space<vmem>>) attributes {dimension_semantics = [#tpu.dimension_semantics<parallel>, #tpu.dimension_semantics<parallel>], iteration_bounds = array<i64: 1, 1>, scalar_prefetch = 0 : i64, scratch_operands = 0 : i64, tpu.core_type = #tpu.core_type<tc>, window_params = [{transform_indices = @transform_0, window_bounds = array<i64: 2, 256>}, {pipeline_mode = #tpu.pipeline_mode<synchronous>, transform_indices = @transform_1, window_bounds = array<i64: 1, 256>}, {transform_indices = @transform_2, window_bounds = array<i64: 2, 256>}]} {
    %c0 = arith.constant 0 : index
    %c0_0 = arith.constant 0 : index
    %0 = vector.load %arg2[%c0, %c0_0] : memref<2x256xf32, #tpu.memory_space<vmem>>, vector<2x256xf32>
    %c0_1 = arith.constant 0 : index
    %c0_2 = arith.constant 0 : index
    %1 = vector.load %arg3[%c0_1, %c0_2] : memref<1x256xf32, #tpu.memory_space<vmem>>, vector<1x256xf32>
    %2 = vector.broadcast %1 : vector<1x256xf32> to vector<2x256xf32>
    %3 = arith.addf %0, %2 : vector<2x256xf32>
    %c0_3 = arith.constant 0 : index
    %c0_4 = arith.constant 0 : index
    %4 = vector.load %arg4[%c0_3, %c0_4] : memref<2x256xf32, #tpu.memory_space<vmem>>, vector<2x256xf32>
    tpu.vector_store %arg4[%c0_3, %c0_4], %3 {strides = array<i32>} : memref<2x256xf32, #tpu.memory_space<vmem>>, vector<2x256xf32>,
    return
  }
  func.func @transform_0(%arg0: i32, %arg1: i32) -> (i32, i32) {
    %c0_i32 = arith.constant 0 : i32
    return %arg1, %arg0 : i32, i32
  }
  func.func @transform_1(%arg0: i32, %arg1: i32) -> (i32, i32) {
    %c0_i32 = arith.constant 0 : i32
    %c0_i32_0 = arith.constant 0 : i32
    return %c0_i32, %arg0 : i32, i32
  }
  func.func @transform_2(%arg0: i32, %arg1: i32) -> (i32, i32) {
    %c0_i32 = arith.constant 0 : i32
    return %arg1, %arg0 : i32, i32
  }
}

</mosaic_0001>

<bundles_post_ra>
// kernel: tpu_custom_call.1
= control target key start
LH: loop header
LB: loop body
LE: loop exit
PB: predicated region body
PF: predicated region fallthrough
CT: control target
= control target key end

     0   :  { %7 = vsyncpa [#allocation3], 0  ;;  %s177_s0 = inlined_call_operand.hbm [shape: f32[2,256], index: 0, kind: input, shape index: {}]   ;;  %s178_s1 = inlined_call_operand.hbm [shape: f32[1,512], index: 1, kind: input, shape index: {}]   ;;  %s179_s2 = inlined_call_operand.hbm [shape: f32[2,256], index: 2, kind: output, shape index: {}]  }
   0x1   :  { %8 = vsyncpa [#allocation6], 0 }
   0x2   :  { %9 = vsyncpa [#allocation4], 0  ;;  %s15_s11 = sshll.u32 %s177_s0, 4  ;;  %s150_s12 = smov [#allocation2]   ;;  %s16_s11 = int_to_ptr.hbm [resolvable:$true] %s15_s11 }
   0x3   :  { %s17_s13 = sshll.u32 %s150_s12, 4  ;;  %s26_s16 = sshll.u32 %s178_s1, 4  ;;  %s18_s13 = int_to_ptr.vmem [resolvable:$true] %s17_s13  ;;  %s27_s16 = int_to_ptr.hbm [resolvable:$true] %s26_s16 }
   0x4   :  { %20 = dma.hbm_to_vmem [thread:$0]  %s16_s11, 64, %s18_s13, [#allocation3]  }
   0x5   :  { %s151_s17 = smov [#allocation5]  }
   0x6   :  { %s28_s18 = sshll.u32 %s151_s17, 4  ;;  %s29_s18 = int_to_ptr.vmem [resolvable:$true] %s28_s18 }
   0x7   :  { %31 = dma.hbm_to_vmem [thread:$0]  %s27_s16, 32, %s29_s18, [#allocation6]  }
   0x8   :  { %144 = dma.done.wait [#allocation3], 64  }
   0x9   :  { %145 = vsyncadd [#allocation3], 4294967232 }
   0xa   :  { %146 = dma.done.wait [#allocation6], 32  }
   0xb   :  { %147 = vsyncadd [#allocation6], 4294967264  ;;  %v41_v0 = vld [vmem:[#allocation5] sm:$0x3]  ;;  %vm46_vm0 = vcmask 1041408   ;;  %s152_s0 = smov [#allocation7]  }
   0xc   :  { %v43_v1 = vperm.slane %v41_v0, 0  ;;  %v44_v2 = vperm.slane %v41_v0, 1  ;;  %v40_v3 = vld [vmem:[#allocation2] sm:$0xf]  ;;  %s56_s19 = sshll.u32 %s152_s0, 4  ;;  %s58_s21 = sshll.u32 %s179_s2, 4  ;;  %s57_s19 = int_to_ptr.vmem [resolvable:$true] %s56_s19  ;;  %s59_s21 = int_to_ptr.hbm [resolvable:$true] %s58_s21 }
   0xe   :  { %v45_v4 = vrot.slane %v44_v2, 6 }
  0x10   :  { %v47_v5 = vsel %vm46_vm0, %v43_v1, %v45_v4 }
  0x11   :  { %v49_v6 = vadd.f32 %v47_v5, %v40_v3 }
  0x13   :  { %50 = vst [vmem:[#allocation7] sm:$0xf] %v49_v6 }
  0x14   :  { %61 = dma.vmem_to_hbm [thread:$0]  %s57_s19, 64, %s59_s21, [#allocation4]  }
  0x15   :  { %148 = dma.done.wait [#allocation4], 64  }
  0x16   :  { %149 = vsyncadd [#allocation4], 4294967232 }
  0x17   :  { %66 = vsyncpa [#allocation3], 1 }
  0x18   :  { %67 = vsyncpa [#allocation6], 1 }
  0x19   :  { %68 = vsyncpa [#allocation4], 1 }

</bundles_post_ra>
